<compile_context>
chip_gen: v5e
topology: v5e:2x2
jax: 0.10.0
libtpu: 0.0.40
codegen_flags: <defaults>
</compile_context>

<pallas_src>
import functools

import jax
import jax.numpy as jnp
from jax.experimental import pallas as pl
from jax.experimental.pallas import tpu as pltpu


def _round_up(x, m):
    return ((x + m - 1) // m) * m


def _default_act_dtype():
    """bf16 elementwise on bf16-capable VPU/EUP chips (v6e/v7x), f32 otherwise."""
    try:
        kind = jax.devices()[0].device_kind.lower()
    except Exception:
        return jnp.bfloat16
    for tag in ("v2", "v3", "v4", "v5"):
        if tag in kind:
            return jnp.float32
    return jnp.bfloat16


# ----------------------------------------------------------------------------
# Kernels
# ----------------------------------------------------------------------------

def _layer(a, w_ref, b_ref, act_dtype, approximate_gelu):
    # MXU matmul with f32 accumulation; bias-add + GELU in act_dtype.
    y = jnp.dot(a.astype(w_ref.dtype), w_ref[...],
                preferred_element_type=jnp.float32)
    y = y.astype(act_dtype) + b_ref[...]
    return jax.nn.gelu(y, approximate=approximate_gelu)


def _bc_actor_kernel_shared(unit_ref,
                            w1_ref, b1_ref, w2_ref, b2_ref, w3_ref, b3_ref,
                            w4u_ref, b4f_ref, w5_ref, b5_ref, w6_ref, b6_ref,
                            out_ref, *, act_dtype, approximate_gelu):
    """Shared (batch-1) map encoding: its contribution is folded into b4f."""
    lay = functools.partial(_layer, act_dtype=act_dtype,
                            approximate_gelu=approximate_gelu)
    h = lay(unit_ref[...], w1_ref, b1_ref)
    h = lay(h, w2_ref, b2_ref)
    uf = lay(h, w3_ref, b3_ref)
    p = lay(uf, w4u_ref, b4f_ref)          # b4f = map @ W4m + b4 (host-folded)
    p = lay(p, w5_ref, b5_ref)
    y = jnp.dot(p.astype(w6_ref.dtype), w6_ref[...],
                preferred_element_type=jnp.float32) + b6_ref[...]
    out_ref[...] = y.astype(out_ref.dtype)


def _bc_actor_kernel_batched(map_ref, unit_ref,
                             w1_ref, b1_ref, w2_ref, b2_ref, w3_ref, b3_ref,
                             w4m_ref, w4u_ref, b4_ref, w5_ref, b5_ref,
                             w6_ref, b6_ref, out_ref,
                             *, act_dtype, approximate_gelu):
    """Per-row map encoding: split matmul instead of an in-kernel concat."""
    lay = functools.partial(_layer, act_dtype=act_dtype,
                            approximate_gelu=approximate_gelu)
    h = lay(unit_ref[...], w1_ref, b1_ref)
    h = lay(h, w2_ref, b2_ref)
    uf = lay(h, w3_ref, b3_ref)
    m_part = jnp.dot(map_ref[...].astype(w4m_ref.dtype), w4m_ref[...],
                     preferred_element_type=jnp.float32)
    u_part = jnp.dot(uf.astype(w4u_ref.dtype), w4u_ref[...],
                     preferred_element_type=jnp.float32)
    p = jax.nn.gelu((m_part + u_part).astype(act_dtype) + b4_ref[...],
                    approximate=approximate_gelu)
    p = lay(p, w5_ref, b5_ref)
    y = jnp.dot(p.astype(w6_ref.dtype), w6_ref[...],
                preferred_element_type=jnp.float32) + b6_ref[...]
    out_ref[...] = y.astype(out_ref.dtype)


# ----------------------------------------------------------------------------
# Host wrapper
# ----------------------------------------------------------------------------

def bc_actor_forward(map_encoding, unit_input, params, *,
                     block_b=1024,
                     weight_dtype=jnp.bfloat16,
                     act_dtype=None,
                     out_dtype=jnp.float32,
                     approximate_gelu=True):
    """map_encoding: (1, Dm) or (B, Dm); unit_input: (B, Du) -> (B, n_actions)."""
    (w1, b1, w2, b2, w3, b3, w4m, w4u, b4, w5, b5, w6, b6) = params
    B, Du = unit_input.shape
    Dm = map_encoding.shape[1]
    n_actions = w6.shape[1]
    if act_dtype is None:
        act_dtype = _default_act_dtype()

    # ---- lane-dense output: pad the final layer to a multiple of 128 lanes.
    n_pad = _round_up(n_actions, 128)
    if n_pad != n_actions:
        w6 = jnp.pad(w6, ((0, 0), (0, n_pad - n_actions)))
        b6 = jnp.pad(b6, ((0, 0), (0, n_pad - n_actions)))

    shared_map = (map_encoding.shape[0] == 1)

    # ---- bf16 weights for the MXU; biases in the activation dtype.
    w1, w2, w3, w4m, w4u, w5, w6 = (
        w.astype(weight_dtype) for w in (w1, w2, w3, w4m, w4u, w5, w6))
    b1, b2, b3, b5 = (b.astype(act_dtype) for b in (b1, b2, b3, b5))
    b6 = b6.astype(jnp.float32)

    # ---- batch tiling (TB multiple of 8; >= 2 tiles when batch is splittable).
    B8 = _round_up(B, 8)
    TB = _round_up(min(block_b, B8), 8)
    if B8 // TB < 2 and B8 >= 16:
        TB = _round_up(-(-B8 // 2), 8)          # ceil(B8/2) rounded up to 8
    B_pad = _round_up(B, TB)
    if B_pad != B:
        unit_input = jnp.pad(unit_input, ((0, B_pad - B), (0, 0)))
    grid = (B_pad // TB,)

    def pinned(a):
        n = a.ndim
        return pl.BlockSpec(a.shape, lambda i, n=n: (0,) * n)

    if shared_map:
        # Fold: concat(m, u) @ W4 + b4 == u @ W4u + (m @ W4m + b4).
        b4f = (map_encoding.astype(jnp.float32) @ params[6].astype(jnp.float32)
               + params[8]).astype(act_dtype)                     # (1, 128)
        wb = (w1, b1, w2, b2, w3, b3, w4u, b4f, w5, b5, w6, b6)
        kernel = functools.partial(_bc_actor_kernel_shared,
                                   act_dtype=act_dtype,
                                   approximate_gelu=approximate_gelu)
        in_specs = ([pl.BlockSpec((TB, Du), lambda i: (i, 0))]
                    + [pinned(a) for a in wb])
        args = (unit_input, *wb)
    else:
        assert map_encoding.shape[0] == B, "map_encoding batch must be 1 or B"
        if B_pad != B:
            map_encoding = jnp.pad(map_encoding, ((0, B_pad - B), (0, 0)))
        b4 = b4.astype(act_dtype)
        wb = (w1, b1, w2, b2, w3, b3, w4m, w4u, b4, w5, b5, w6, b6)
        kernel = functools.partial(_bc_actor_kernel_batched,
                                   act_dtype=act_dtype,
                                   approximate_gelu=approximate_gelu)
        in_specs = ([pl.BlockSpec((TB, Dm), lambda i: (i, 0)),
                     pl.BlockSpec((TB, Du), lambda i: (i, 0))]
                    + [pinned(a) for a in wb])
        args = (map_encoding, unit_input, *wb)

    out = pl.pallas_call(
        kernel,
        out_shape=jax.ShapeDtypeStruct((B_pad, n_pad), out_dtype),
        grid=grid,
        in_specs=in_specs,
        out_specs=pl.BlockSpec((TB, n_pad), lambda i: (i, 0)),
        compiler_params=pltpu.CompilerParams(
            # Independent batch tiles -> megacore sharding on v7x.
            dimension_semantics=("parallel",),
            # Explicit, generous but safe on every generation (v7x: 64 MiB phys).
            vmem_limit_bytes=32 * 1024 * 1024),
    )(*args)

    # TODO(synk): for v5e at very large B, pack the n_actions logits densely
    # (or emit bf16 output) instead of slicing a 128-lane-padded f32 slab.
    return out[:B, :n_actions]


# ----------------------------------------------------------------------------
# Parameters & references
# ----------------------------------------------------------------------------

def init_params(key, map_encoding_dim, unit_feature_dim, n_actions):
    """Deterministic synthetic parameters (same shapes as the torch module)."""
    def linear(k, fan_in, fan_out):
        kw, kb = jax.random.split(k)
        bound = 1.0 / jnp.sqrt(fan_in)
        w = jax.random.uniform(kw, (fan_in, fan_out), jnp.float32, -bound, bound)
        b = jax.random.uniform(kb, (1, fan_out), jnp.float32, -bound, bound)
        return w, b

    ks = jax.random.split(key, 6)
    w1, b1 = linear(ks[0], unit_feature_dim, 128)
    w2, b2 = linear(ks[1], 128, 128)
    w3, b3 = linear(ks[2], 128, 64)
    w4, b4 = linear(ks[3], map_encoding_dim + 64, 128)
    w4m, w4u = w4[:map_encoding_dim], w4[map_encoding_dim:]
    w5, b5 = linear(ks[4], 128, 128)
    w6, b6 = linear(ks[5], 128, n_actions)
    return (w1, b1, w2, b2, w3, b3, w4m, w4u, b4, w5, b5, w6, b6)


def bc_actor_reference_f32(map_encoding, unit_input, params):
    """Pure-JAX f32 / exact-erf reference (matches torch eval-mode forward)."""
    (w1, b1, w2, b2, w3, b3, w4m, w4u, b4, w5, b5, w6, b6) = params
    B = unit_input.shape[0]
    if map_encoding.shape[0] == 1 and B > 1:
        map_encoding = jnp.broadcast_to(map_encoding, (B, map_encoding.shape[1]))
    g = lambda x: jax.nn.gelu(x, approximate=False)
    h = g(unit_input @ w1 + b1)
    h = g(h @ w2 + b2)
    uf = g(h @ w3 + b3)
    p = g(map_encoding @ w4m + uf @ w4u + b4)
    p = g(p @ w5 + b5)
    return p @ w6 + b6


def bc_actor_reference_matched(map_encoding, unit_input, params, *,
                               weight_dtype=jnp.bfloat16,
                               act_dtype=jnp.bfloat16,
                               approximate_gelu=True):
    """Pure-JAX reference with the kernel's dtype pattern (bf16 MXU inputs,
    f32 accumulation, bias-add + GELU in act_dtype)."""
    (w1, b1, w2, b2, w3, b3, w4m, w4u, b4, w5, b5, w6, b6) = params
    B = unit_input.shape[0]
    if map_encoding.shape[0] == 1 and B > 1:
        map_encoding = jnp.broadcast_to(map_encoding, (B, map_encoding.shape[1]))

    def dot(a, w):
        return jnp.dot(a.astype(weight_dtype), w.astype(weight_dtype),
                       preferred_element_type=jnp.float32)

    def act(y, b):
        return jax.nn.gelu(y.astype(act_dtype) + b.astype(act_dtype),
                           approximate=approximate_gelu)

    h = act(dot(unit_input, w1), b1)
    h = act(dot(h, w2), b2)
    uf = act(dot(h, w3), b3)
    p = act(dot(map_encoding, w4m) + dot(uf, w4u), b4)
    p = act(dot(p, w5), b5)
    return (dot(p, w6) + b6).astype(jnp.float32)


# ----------------------------------------------------------------------------
# Test
# ----------------------------------------------------------------------------

if __name__ == "__main__":
    B = 4
    map_encoding_dim = 32
    unit_feature_dim = 9      # the "9-dimensional unit state"
    n_actions = 8

    key = jax.random.PRNGKey(0)
    k_params, k_map, k_unit, k_map_b, k_unit_big = jax.random.split(key, 5)

    params = init_params(k_params, map_encoding_dim, unit_feature_dim, n_actions)
    unit_input = jax.random.normal(k_unit, (B, unit_feature_dim), jnp.float32)
    act_dtype = _default_act_dtype()

    def check(logits, map_enc, unit_in, name):
        assert logits.shape == (unit_in.shape[0], n_actions), name
        ref_m = bc_actor_reference_matched(map_enc, unit_in, params,
                                           weight_dtype=jnp.bfloat16,
                                           act_dtype=act_dtype,
                                           approximate_gelu=True)
        ref_f = bc_actor_reference_f32(map_enc, unit_in, params)
        assert jnp.allclose(logits, ref_m, atol=5e-2, rtol=5e-2), \
            f"{name}: mismatch vs matched reference"
        assert jnp.allclose(logits, ref_f, atol=1.5e-1, rtol=1.5e-1), \
            f"{name}: mismatch vs exact f32 reference"

    # Case 1: shared (batch-1) map encoding -> folded-bias kernel branch.
    map_shared = jax.random.normal(k_map, (1, map_encoding_dim), jnp.float32)
    logits = jax.block_until_ready(
        bc_actor_forward(map_shared, unit_input, params, act_dtype=act_dtype))
    check(logits, map_shared, unit_input, "shared-map")

    # Case 2: per-row map encoding -> split-matmul kernel branch.
    map_batched = jax.random.normal(k_map_b, (B, map_encoding_dim), jnp.float32)
    logits_b = jax.block_until_ready(
        bc_actor_forward(map_batched, unit_input, params, act_dtype=act_dtype))
    check(logits_b, map_batched, unit_input, "batched-map")

    # Case 3: larger batch -> padding + >=2 grid tiles (megacore split path).
    B_big = 40
    unit_big = jax.random.normal(k_unit_big, (B_big, unit_feature_dim),
                                 jnp.float32)
    logits_big = jax.block_until_ready(
        bc_actor_forward(map_shared, unit_big, params, act_dtype=act_dtype))
    check(logits_big, map_shared, unit_big, "shared-map-batch40")

    print("KERNEL_OK")
</pallas_src>

<mosaic_0001>
module attributes {stable_mosaic.version = 11 : i64} {
  func.func @_bc_actor_kernel_shared(%arg0: i32, %arg1: memref<8x9xf32, #tpu.memory_space<vmem>>, %arg2: memref<9x128xbf16, #tpu.memory_space<vmem>>, %arg3: memref<1x128xbf16, #tpu.memory_space<vmem>>, %arg4: memref<128x128xbf16, #tpu.memory_space<vmem>>, %arg5: memref<1x128xbf16, #tpu.memory_space<vmem>>, %arg6: memref<128x64xbf16, #tpu.memory_space<vmem>>, %arg7: memref<1x64xbf16, #tpu.memory_space<vmem>>, %arg8: memref<64x128xbf16, #tpu.memory_space<vmem>>, %arg9: memref<1x128xbf16, #tpu.memory_space<vmem>>, %arg10: memref<128x128xbf16, #tpu.memory_space<vmem>>, %arg11: memref<1x128xbf16, #tpu.memory_space<vmem>>, %arg12: memref<128x128xbf16, #tpu.memory_space<vmem>>, %arg13: memref<1x128xf32, #tpu.memory_space<vmem>>, %arg14: memref<8x128xf32, #tpu.memory_space<vmem>>) attributes {dimension_semantics = [#tpu.dimension_semantics<parallel>], iteration_bounds = array<i64: 1>, scalar_prefetch = 0 : i64, scratch_operands = 0 : i64, tpu.core_type = #tpu.core_type<tc>, window_params = [{transform_indices = @transform_0, window_bounds = array<i64: 8, 9>}, {pipeline_mode = #tpu.pipeline_mode<synchronous>, transform_indices = @transform_1, window_bounds = array<i64: 9, 128>}, {pipeline_mode = #tpu.pipeline_mode<synchronous>, transform_indices = @transform_2, window_bounds = array<i64: 1, 128>}, {pipeline_mode = #tpu.pipeline_mode<synchronous>, transform_indices = @transform_3, window_bounds = array<i64: 128, 128>}, {pipeline_mode = #tpu.pipeline_mode<synchronous>, transform_indices = @transform_4, window_bounds = array<i64: 1, 128>}, {pipeline_mode = #tpu.pipeline_mode<synchronous>, transform_indices = @transform_5, window_bounds = array<i64: 128, 64>}, {pipeline_mode = #tpu.pipeline_mode<synchronous>, transform_indices = @transform_6, window_bounds = array<i64: 1, 64>}, {pipeline_mode = #tpu.pipeline_mode<synchronous>, transform_indices = @transform_7, window_bounds = array<i64: 64, 128>}, {pipeline_mode = #tpu.pipeline_mode<synchronous>, transform_indices = @transform_8, window_bounds = array<i64: 1, 128>}, {pipeline_mode = #tpu.pipeline_mode<synchronous>, transform_indices = @transform_9, window_bounds = array<i64: 128, 128>}, {pipeline_mode = #tpu.pipeline_mode<synchronous>, transform_indices = @transform_10, window_bounds = array<i64: 1, 128>}, {pipeline_mode = #tpu.pipeline_mode<synchronous>, transform_indices = @transform_11, window_bounds = array<i64: 128, 128>}, {pipeline_mode = #tpu.pipeline_mode<synchronous>, transform_indices = @transform_12, window_bounds = array<i64: 1, 128>}, {transform_indices = @transform_13, window_bounds = array<i64: 8, 128>}]} {
    %c0 = arith.constant 0 : index
    %c0_0 = arith.constant 0 : index
    %0 = vector.load %arg1[%c0, %c0_0] : memref<8x9xf32, #tpu.memory_space<vmem>>, vector<8x9xf32>
    %1 = arith.truncf %0 : vector<8x9xf32> to vector<8x9xbf16>
    %c0_1 = arith.constant 0 : index
    %c0_2 = arith.constant 0 : index
    %2 = vector.load %arg2[%c0_1, %c0_2] : memref<9x128xbf16, #tpu.memory_space<vmem>>, vector<9x128xbf16>
    %cst = arith.constant dense<0.000000e+00> : vector<8x128xf32>
    %3 = tpu.matmul %1, %2, %cst {dimension_numbers = #tpu.dot_dimension_numbers<[1], [0], [0], [1], [0, 0, 1, 1], [], []>} : vector<8x9xbf16>, vector<9x128xbf16>, vector<8x128xf32> -> vector<8x128xf32>
    %4 = arith.truncf %3 : vector<8x128xf32> to vector<8x128xbf16>
    %c0_3 = arith.constant 0 : index
    %c0_4 = arith.constant 0 : index
    %5 = vector.load %arg3[%c0_3, %c0_4] : memref<1x128xbf16, #tpu.memory_space<vmem>>, vector<1x128xbf16>
    %6 = vector.broadcast %5 : vector<1x128xbf16> to vector<8x128xbf16>
    %7 = arith.addf %4, %6 : vector<8x128xbf16>
    %8 = arith.mulf %7, %7 : vector<8x128xbf16>
    %9 = arith.mulf %7, %8 : vector<8x128xbf16>
    %cst_5 = arith.constant 4.467770e-02 : bf16
    %10 = vector.broadcast %cst_5 : bf16 to vector<8x128xbf16>
    %11 = arith.mulf %10, %9 : vector<8x128xbf16>
    %12 = arith.addf %7, %11 : vector<8x128xbf16>
    %cst_6 = arith.constant 7.968750e-01 : bf16
    %13 = vector.broadcast %cst_6 : bf16 to vector<8x128xbf16>
    %14 = arith.mulf %13, %12 : vector<8x128xbf16>
    %15 = math.tanh %14 : vector<8x128xbf16>
    %cst_7 = arith.constant 1.000000e+00 : bf16
    %16 = vector.broadcast %cst_7 : bf16 to vector<8x128xbf16>
    %17 = arith.addf %16, %15 : vector<8x128xbf16>
    %cst_8 = arith.constant 5.000000e-01 : bf16
    %18 = vector.broadcast %cst_8 : bf16 to vector<8x128xbf16>
    %19 = arith.mulf %18, %17 : vector<8x128xbf16>
    %20 = arith.mulf %7, %19 : vector<8x128xbf16>
    %c0_9 = arith.constant 0 : index
    %c0_10 = arith.constant 0 : index
    %21 = vector.load %arg4[%c0_9, %c0_10] : memref<128x128xbf16, #tpu.memory_space<vmem>>, vector<128x128xbf16>
    %cst_11 = arith.constant dense<0.000000e+00> : vector<8x128xf32>
    %22 = tpu.matmul %20, %21, %cst_11 {dimension_numbers = #tpu.dot_dimension_numbers<[1], [0], [0], [1], [0, 0, 1, 1], [], []>} : vector<8x128xbf16>, vector<128x128xbf16>, vector<8x128xf32> -> vector<8x128xf32>
    %23 = arith.truncf %22 : vector<8x128xf32> to vector<8x128xbf16>
    %c0_12 = arith.constant 0 : index
    %c0_13 = arith.constant 0 : index
    %24 = vector.load %arg5[%c0_12, %c0_13] : memref<1x128xbf16, #tpu.memory_space<vmem>>, vector<1x128xbf16>
    %25 = vector.broadcast %24 : vector<1x128xbf16> to vector<8x128xbf16>
    %26 = arith.addf %23, %25 : vector<8x128xbf16>
    %27 = arith.mulf %26, %26 : vector<8x128xbf16>
    %28 = arith.mulf %26, %27 : vector<8x128xbf16>
    %cst_14 = arith.constant 4.467770e-02 : bf16
    %29 = vector.broadcast %cst_14 : bf16 to vector<8x128xbf16>
    %30 = arith.mulf %29, %28 : vector<8x128xbf16>
    %31 = arith.addf %26, %30 : vector<8x128xbf16>
    %cst_15 = arith.constant 7.968750e-01 : bf16
    %32 = vector.broadcast %cst_15 : bf16 to vector<8x128xbf16>
    %33 = arith.mulf %32, %31 : vector<8x128xbf16>
    %34 = math.tanh %33 : vector<8x128xbf16>
    %cst_16 = arith.constant 1.000000e+00 : bf16
    %35 = vector.broadcast %cst_16 : bf16 to vector<8x128xbf16>
    %36 = arith.addf %35, %34 : vector<8x128xbf16>
    %cst_17 = arith.constant 5.000000e-01 : bf16
    %37 = vector.broadcast %cst_17 : bf16 to vector<8x128xbf16>
    %38 = arith.mulf %37, %36 : vector<8x128xbf16>
    %39 = arith.mulf %26, %38 : vector<8x128xbf16>
    %c0_18 = arith.constant 0 : index
    %c0_19 = arith.constant 0 : index
    %40 = vector.load %arg6[%c0_18, %c0_19] : memref<128x64xbf16, #tpu.memory_space<vmem>>, vector<128x64xbf16>
    %cst_20 = arith.constant dense<0.000000e+00> : vector<8x64xf32>
    %41 = tpu.matmul %39, %40, %cst_20 {dimension_numbers = #tpu.dot_dimension_numbers<[1], [0], [0], [1], [0, 0, 1, 1], [], []>} : vector<8x128xbf16>, vector<128x64xbf16>, vector<8x64xf32> -> vector<8x64xf32>
    %42 = arith.truncf %41 : vector<8x64xf32> to vector<8x64xbf16>
    %c0_21 = arith.constant 0 : index
    %c0_22 = arith.constant 0 : index
    %43 = vector.load %arg7[%c0_21, %c0_22] : memref<1x64xbf16, #tpu.memory_space<vmem>>, vector<1x64xbf16>
    %44 = vector.broadcast %43 : vector<1x64xbf16> to vector<8x64xbf16>
    %45 = arith.addf %42, %44 : vector<8x64xbf16>
    %46 = arith.mulf %45, %45 : vector<8x64xbf16>
    %47 = arith.mulf %45, %46 : vector<8x64xbf16>
    %cst_23 = arith.constant 4.467770e-02 : bf16
    %48 = vector.broadcast %cst_23 : bf16 to vector<8x64xbf16>
    %49 = arith.mulf %48, %47 : vector<8x64xbf16>
    %50 = arith.addf %45, %49 : vector<8x64xbf16>
    %cst_24 = arith.constant 7.968750e-01 : bf16
    %51 = vector.broadcast %cst_24 : bf16 to vector<8x64xbf16>
    %52 = arith.mulf %51, %50 : vector<8x64xbf16>
    %53 = math.tanh %52 : vector<8x64xbf16>
    %cst_25 = arith.constant 1.000000e+00 : bf16
    %54 = vector.broadcast %cst_25 : bf16 to vector<8x64xbf16>
    %55 = arith.addf %54, %53 : vector<8x64xbf16>
    %cst_26 = arith.constant 5.000000e-01 : bf16
    %56 = vector.broadcast %cst_26 : bf16 to vector<8x64xbf16>
    %57 = arith.mulf %56, %55 : vector<8x64xbf16>
    %58 = arith.mulf %45, %57 : vector<8x64xbf16>
    %c0_27 = arith.constant 0 : index
    %c0_28 = arith.constant 0 : index
    %59 = vector.load %arg8[%c0_27, %c0_28] : memref<64x128xbf16, #tpu.memory_space<vmem>>, vector<64x128xbf16>
    %cst_29 = arith.constant dense<0.000000e+00> : vector<8x128xf32>
    %60 = tpu.matmul %58, %59, %cst_29 {dimension_numbers = #tpu.dot_dimension_numbers<[1], [0], [0], [1], [0, 0, 1, 1], [], []>} : vector<8x64xbf16>, vector<64x128xbf16>, vector<8x128xf32> -> vector<8x128xf32>
    %61 = arith.truncf %60 : vector<8x128xf32> to vector<8x128xbf16>
    %c0_30 = arith.constant 0 : index
    %c0_31 = arith.constant 0 : index
    %62 = vector.load %arg9[%c0_30, %c0_31] : memref<1x128xbf16, #tpu.memory_space<vmem>>, vector<1x128xbf16>
    %63 = vector.broadcast %62 : vector<1x128xbf16> to vector<8x128xbf16>
    %64 = arith.addf %61, %63 : vector<8x128xbf16>
    %65 = arith.mulf %64, %64 : vector<8x128xbf16>
    %66 = arith.mulf %64, %65 : vector<8x128xbf16>
    %cst_32 = arith.constant 4.467770e-02 : bf16
    %67 = vector.broadcast %cst_32 : bf16 to vector<8x128xbf16>
    %68 = arith.mulf %67, %66 : vector<8x128xbf16>
    %69 = arith.addf %64, %68 : vector<8x128xbf16>
    %cst_33 = arith.constant 7.968750e-01 : bf16
    %70 = vector.broadcast %cst_33 : bf16 to vector<8x128xbf16>
    %71 = arith.mulf %70, %69 : vector<8x128xbf16>
    %72 = math.tanh %71 : vector<8x128xbf16>
    %cst_34 = arith.constant 1.000000e+00 : bf16
    %73 = vector.broadcast %cst_34 : bf16 to vector<8x128xbf16>
    %74 = arith.addf %73, %72 : vector<8x128xbf16>
    %cst_35 = arith.constant 5.000000e-01 : bf16
    %75 = vector.broadcast %cst_35 : bf16 to vector<8x128xbf16>
    %76 = arith.mulf %75, %74 : vector<8x128xbf16>
    %77 = arith.mulf %64, %76 : vector<8x128xbf16>
    %c0_36 = arith.constant 0 : index
    %c0_37 = arith.constant 0 : index
    %78 = vector.load %arg10[%c0_36, %c0_37] : memref<128x128xbf16, #tpu.memory_space<vmem>>, vector<128x128xbf16>
    %cst_38 = arith.constant dense<0.000000e+00> : vector<8x128xf32>
    %79 = tpu.matmul %77, %78, %cst_38 {dimension_numbers = #tpu.dot_dimension_numbers<[1], [0], [0], [1], [0, 0, 1, 1], [], []>} : vector<8x128xbf16>, vector<128x128xbf16>, vector<8x128xf32> -> vector<8x128xf32>
    %80 = arith.truncf %79 : vector<8x128xf32> to vector<8x128xbf16>
    %c0_39 = arith.constant 0 : index
    %c0_40 = arith.constant 0 : index
    %81 = vector.load %arg11[%c0_39, %c0_40] : memref<1x128xbf16, #tpu.memory_space<vmem>>, vector<1x128xbf16>
    %82 = vector.broadcast %81 : vector<1x128xbf16> to vector<8x128xbf16>
    %83 = arith.addf %80, %82 : vector<8x128xbf16>
    %84 = arith.mulf %83, %83 : vector<8x128xbf16>
    %85 = arith.mulf %83, %84 : vector<8x128xbf16>
    %cst_41 = arith.constant 4.467770e-02 : bf16
    %86 = vector.broadcast %cst_41 : bf16 to vector<8x128xbf16>
    %87 = arith.mulf %86, %85 : vector<8x128xbf16>
    %88 = arith.addf %83, %87 : vector<8x128xbf16>
    %cst_42 = arith.constant 7.968750e-01 : bf16
    %89 = vector.broadcast %cst_42 : bf16 to vector<8x128xbf16>
    %90 = arith.mulf %89, %88 : vector<8x128xbf16>
    %91 = math.tanh %90 : vector<8x128xbf16>
    %cst_43 = arith.constant 1.000000e+00 : bf16
    %92 = vector.broadcast %cst_43 : bf16 to vector<8x128xbf16>
    %93 = arith.addf %92, %91 : vector<8x128xbf16>
    %cst_44 = arith.constant 5.000000e-01 : bf16
    %94 = vector.broadcast %cst_44 : bf16 to vector<8x128xbf16>
    %95 = arith.mulf %94, %93 : vector<8x128xbf16>
    %96 = arith.mulf %83, %95 : vector<8x128xbf16>
    %c0_45 = arith.constant 0 : index
    %c0_46 = arith.constant 0 : index
    %97 = vector.load %arg12[%c0_45, %c0_46] : memref<128x128xbf16, #tpu.memory_space<vmem>>, vector<128x128xbf16>
    %cst_47 = arith.constant dense<0.000000e+00> : vector<8x128xf32>
    %98 = tpu.matmul %96, %97, %cst_47 {dimension_numbers = #tpu.dot_dimension_numbers<[1], [0], [0], [1], [0, 0, 1, 1], [], []>} : vector<8x128xbf16>, vector<128x128xbf16>, vector<8x128xf32> -> vector<8x128xf32>
    %c0_48 = arith.constant 0 : index
    %c0_49 = arith.constant 0 : index
    %99 = vector.load %arg13[%c0_48, %c0_49] : memref<1x128xf32, #tpu.memory_space<vmem>>, vector<1x128xf32>
    %100 = vector.broadcast %99 : vector<1x128xf32> to vector<8x128xf32>
    %101 = arith.addf %98, %100 : vector<8x128xf32>
    %c0_50 = arith.constant 0 : index
    %c0_51 = arith.constant 0 : index
    %102 = vector.load %arg14[%c0_50, %c0_51] : memref<8x128xf32, #tpu.memory_space<vmem>>, vector<8x128xf32>
    tpu.vector_store %arg14[%c0_50, %c0_51], %101 {strides = array<i32>} : memref<8x128xf32, #tpu.memory_space<vmem>>, vector<8x128xf32>,
    return
  }
  func.func @transform_0(%arg0: i32) -> (i32, i32) {
    %c0_i32 = arith.constant 0 : i32
    %c0_i32_0 = arith.constant 0 : i32
    return %arg0, %c0_i32 : i32, i32
  }
  func.func @transform_1(%arg0: i32) -> (i32, i32) {
    %c0_i32 = arith.constant 0 : i32
    %c0_i32_0 = arith.constant 0 : i32
    %c0_i32_1 = arith.constant 0 : i32
    return %c0_i32, %c0_i32_0 : i32, i32
  }
  func.func @transform_2(%arg0: i32) -> (i32, i32) {
    %c0_i32 = arith.constant 0 : i32
    %c0_i32_0 = arith.constant 0 : i32
    %c0_i32_1 = arith.constant 0 : i32
    return %c0_i32, %c0_i32_0 : i32, i32
  }
  func.func @transform_3(%arg0: i32) -> (i32, i32) {
    %c0_i32 = arith.constant 0 : i32
    %c0_i32_0 = arith.constant 0 : i32
    %c0_i32_1 = arith.constant 0 : i32
    return %c0_i32, %c0_i32_0 : i32, i32
  }
  func.func @transform_4(%arg0: i32) -> (i32, i32) {
    %c0_i32 = arith.constant 0 : i32
    %c0_i32_0 = arith.constant 0 : i32
    %c0_i32_1 = arith.constant 0 : i32
    return %c0_i32, %c0_i32_0 : i32, i32
  }
  func.func @transform_5(%arg0: i32) -> (i32, i32) {
    %c0_i32 = arith.constant 0 : i32
    %c0_i32_0 = arith.constant 0 : i32
    %c0_i32_1 = arith.constant 0 : i32
    return %c0_i32, %c0_i32_0 : i32, i32
  }
  func.func @transform_6(%arg0: i32) -> (i32, i32) {
    %c0_i32 = arith.constant 0 : i32
    %c0_i32_0 = arith.constant 0 : i32
    %c0_i32_1 = arith.constant 0 : i32
    return %c0_i32, %c0_i32_0 : i32, i32
  }
  func.func @transform_7(%arg0: i32) -> (i32, i32) {
    %c0_i32 = arith.constant 0 : i32
    %c0_i32_0 = arith.constant 0 : i32
    %c0_i32_1 = arith.constant 0 : i32
    return %c0_i32, %c0_i32_0 : i32, i32
  }
  func.func @transform_8(%arg0: i32) -> (i32, i32) {
    %c0_i32 = arith.constant 0 : i32
    %c0_i32_0 = arith.constant 0 : i32
    %c0_i32_1 = arith.constant 0 : i32
    return %c0_i32, %c0_i32_0 : i32, i32
  }
  func.func @transform_9(%arg0: i32) -> (i32, i32) {
    %c0_i32 = arith.constant 0 : i32
    %c0_i32_0 = arith.constant 0 : i32
    %c0_i32_1 = arith.constant 0 : i32
    return %c0_i32, %c0_i32_0 : i32, i32
  }
  func.func @transform_10(%arg0: i32) -> (i32, i32) {
    %c0_i32 = arith.constant 0 : i32
    %c0_i32_0 = arith.constant 0 : i32
    %c0_i32_1 = arith.constant 0 : i32
    return %c0_i32, %c0_i32_0 : i32, i32
  }
  func.func @transform_11(%arg0: i32) -> (i32, i32) {
    %c0_i32 = arith.constant 0 : i32
    %c0_i32_0 = arith.constant 0 : i32
    %c0_i32_1 = arith.constant 0 : i32
    return %c0_i32, %c0_i32_0 : i32, i32
  }
  func.func @transform_12(%arg0: i32) -> (i32, i32) {
    %c0_i32 = arith.constant 0 : i32
    %c0_i32_0 = arith.constant 0 : i32
    %c0_i32_1 = arith.constant 0 : i32
    return %c0_i32, %c0_i32_0 : i32, i32
  }
  func.func @transform_13(%arg0: i32) -> (i32, i32) {
    %c0_i32 = arith.constant 0 : i32
    %c0_i32_0 = arith.constant 0 : i32
    return %arg0, %c0_i32 : i32, i32
  }
}

</mosaic_0001>

<bundles_post_ra>
// kernel: tpu_custom_call.1
= control target key start
LH: loop header
LB: loop body
LE: loop exit
PB: predicated region body
PF: predicated region fallthrough
CT: control target
= control target key end

     0   :  { %18 = vsyncpa [#allocation3], 0  ;;  %s1211_s0 = inlined_call_operand.hbm [shape: f32[8,9], index: 0, kind: input, shape index: {}]   ;;  %s1212_s1 = inlined_call_operand.hbm [shape: bf16[9,128], index: 1, kind: input, shape index: {}]   ;;  %s1213_s2 = inlined_call_operand.vmem [shape: bf16[1,128], index: 2, kind: input, shape index: {}]   ;;  %s1214_s3 = inlined_call_operand.vmem [shape: bf16[128,128], index: 3, kind: input, shape index: {}]   ;;  %s1215_s4 = inlined_call_operand.vmem [shape: bf16[1,128], index: 4, kind: input, shape index: {}]   ;;  %s1216_s5 = inlined_call_operand.vmem [shape: bf16[128,64], index: 5, kind: input, shape index: {}]   ;;  %s1217_s6 = inlined_call_operand.vmem [shape: bf16[1,64], index: 6, kind: input, shape index: {}]   ;;  %s1218_s7 = inlined_call_operand.vmem [shape: bf16[64,128], index: 7, kind: input, shape index: {}]   ;;  %s1219_s8 = inlined_call_operand.vmem [shape: bf16[1,128], index: 8, kind: input, shape index: {}]   ;;  %s1220_s9 = inlined_call_operand.hbm [shape: bf16[128,128], index: 9, kind: input, shape index: {}]   ;;  %s1221_s10 = inlined_call_operand.vmem [shape: bf16[1,128], index: 10, kind: input, shape index: {}]   ;;  %s1222_s11 = inlined_call_operand.hbm [shape: bf16[128,128], index: 11, kind: input, shape index: {}]   ;;  %s1223_s12 = inlined_call_operand.vmem [shape: f32[1,128], index: 12, kind: input, shape index: {}]   ;;  %s1224_s13 = inlined_call_operand.hbm [shape: f32[8,128], index: 13, kind: output, shape index: {}]  }
   0x1   :  { %19 = vsyncpa [#allocation6], 0 }
   0x2   :  { %20 = vsyncpa [#allocation9], 0  ;;  %s37_s27 = sshll.u32 %s1212_s1, 4  ;;  %s38_s27 = int_to_ptr.hbm [resolvable:$true] %s37_s27 }
   0x3   :  { %21 = vsyncpa [#allocation4], 0  ;;  %s1040_s28 = smov [#allocation5]   ;;  %s27_s15 = sshll.u32 %s1211_s0, 4  ;;  %s28_s15 = int_to_ptr.hbm [resolvable:$true] %s27_s15 }
   0x4   :  { %s39_s29 = sshll.u32 %s1040_s28, 4  ;;  %s1041_s16 = smov 64   ;;  %s40_s29 = int_to_ptr.vmem [resolvable:$true] %s39_s29 }
   0x5   :  { %s1042_s17 = smov 4   ;;  %s1043_s18 = smov [#allocation2]  }
   0x6   :  { %45 = dma.hbm_to_vmem [thread:$0]  %s38_s27, 128, %s40_s29, [#allocation6], %s1041_s16, %s1041_s16, %s1042_s17  }
   0x7   :  { %s29_s19 = sshll.u32 %s1043_s18, 4  ;;  %s64_s22 = sshll.u32 %s1220_s9, 4  ;;  %s30_s19 = int_to_ptr.vmem [resolvable:$true] %s29_s19  ;;  %s65_s22 = int_to_ptr.hbm [resolvable:$true] %s64_s22 }
   0x8   :  { %32 = dma.hbm_to_vmem [thread:$0]  %s28_s15, 128, %s30_s19, [#allocation3]  }
   0x9   :  { %s79_s24 = sshll.u32 %s1222_s11, 4  ;;  %s1044_s25 = smov [#allocation7]   ;;  %s80_s24 = int_to_ptr.hbm [resolvable:$true] %s79_s24 }
   0xa   :  { %s66_s26 = sshll.u32 %s1044_s25, 4  ;;  %s1045_s0 = smov [#allocation8]   ;;  %s67_s26 = int_to_ptr.vmem [resolvable:$true] %s66_s26 }
   0xb   :  { %72 = dma.hbm_to_vmem [thread:$0]  %s65_s22, 1024, %s67_s26, [#allocation6], %s1041_s16, %s1041_s16, %s1042_s17  }
   0xc   :  { %s81_s27 = sshll.u32 %s1045_s0, 4  ;;  %s82_s27 = int_to_ptr.vmem [resolvable:$true] %s81_s27 }
   0xd   :  { %87 = dma.hbm_to_vmem [thread:$0]  %s80_s24, 1024, %s82_s27, [#allocation9], %s1041_s16, %s1041_s16, %s1042_s17  }
   0xe   :  { %1032 = dma.done.wait [#allocation3], 128  }
   0xf   :  { %1033 = vsyncadd [#allocation3], 4294967168 }
  0x10   :  { %1034 = dma.done.wait [#allocation6], 1152  }
  0x11   :  { %1035 = vsyncadd [#allocation6], 4294966144 }
  0x12   :  { %1036 = dma.done.wait [#allocation9], 1024  }
  0x13   :  { %1037 = vsyncadd [#allocation9], 4294966272  ;;  %vm120_vm0 = vcmask 1043456   ;;  %vm121_vm1 = vcmask 1044480   ;;  %v1046_v0 = vmov 65535   ;;  %v107_v6 = vld [vmem:[#allocation2] sm:$0xff] }
  0x14   :  { %v122_v1 = vsel %vm120_vm0, 4294967295, %v1046_v0  ;;  %v708_v2 = vld [vmem:[#allocation5] sm:$0xf]  ;;  %v856_v3 = vld [vmem:[#allocation5] sm:$0x10]  ;;  %v108_v8 = vpack.c.bf16 %v107_v6, %v107_v6  ;;  %vm116_vm2 = vcmask 72704  }
  0x15   :  { %v123_v4 = vsel %vm121_vm1, %v122_v1, 0  ;;  %v709_v5 = vor.u32 %v856_v3, %v708_v2  ;;  %v141_v9 = vld [vmem:[%s1213_s2] sm:$0x1]  ;;  %v864_v12 = vld [vmem:[%s1214_s3 + $0x38] sm:$0xff]  ;;  %v863_v13 = vld [vmem:[%s1214_s3 + $0x30] sm:$0xff]  ;;  %vm437_vm3 = vcmask 523264  }
  0x16   :  { %v143_v10 = vpack.i.b16 %v141_v9, %v141_v9  ;;  %241 = vmatpush.bf16.msra.mxu1 %v864_v12  ;;  %v862_v18 = vld [vmem:[%s1214_s3 + $0x28] sm:$0xff]  ;;  %v861_v21 = vld [vmem:[%s1214_s3 + $0x20] sm:$0xff]  ;;  %v860_v25 = vld [vmem:[%s1214_s3 + $0x18] sm:$0xff]  ;;  %s1047_s9 = smov [#allocation10]   ;;  %s694_s29 = sshll.u32 %s1224_s13, 4  ;;  %s695_s29 = int_to_ptr.hbm [resolvable:$true] %s694_s29 }
  0x17   :  { %v125_v7 = vand.u32 %v709_v5, %v123_v4  ;;  %v859_v28 = vld [vmem:[%s1214_s3 + $0x10] sm:$0xff]  ;;  %v858_v31 = vld [vmem:[%s1214_s3 + $0x8] sm:$0xff]  ;;  %v857_v34 = vld [vmem:[%s1214_s3] sm:$0xff]  ;;  %s692_s11 = sshll.u32 %s1047_s9, 4  ;;  %s693_s11 = int_to_ptr.vmem [resolvable:$true] %s692_s11 }
  0x18   :  { %v145_v11 = vperm.slane %v143_v10, 0  ;;  %v255_v54 = vld [vmem:[%s1215_s4] sm:$0x1]  ;;  %v872_v57 = vld [vmem:[%s1216_s5 + $0x38] sm:$0xff]  ;;  %v871_v58 = vld [vmem:[%s1216_s5 + $0x30] sm:$0xff] }
  0x19   :  { %134 = vmatpush.bf16.msra.mxu0 %v125_v7  ;;  %v257_v55 = vpack.i.b16 %v255_v54, %v255_v54  ;;  %355 = vmatpush.bf16.msra.mxu2 %v872_v57  ;;  %v870_v63 = vld [vmem:[%s1216_s5 + $0x28] sm:$0xff]  ;;  %v869_v2 = vld [vmem:[%s1216_s5 + $0x20] sm:$0xff]  ;;  %v868_v6 = vld [vmem:[%s1216_s5 + $0x18] sm:$0xff] }
  0x1a   :  { %v147_v16 = vunpack.c.l.bf16 %v145_v11  ;;  %242 = vmatpush.bf16.msra.mxu1 %v863_v13  ;;  %v867_v9 = vld [vmem:[%s1216_s5 + $0x10] sm:$0xff]  ;;  %v866_v12 = vld [vmem:[%s1216_s5 + $0x8] sm:$0xff] }
  0x1b   :  { %v259_v56 = vperm.slane %v257_v55, 0 }
  0x1c   :  { %710 = vmatmul.msk.bf16.vlgmr.msra.gmra.mxu0 %vm116_vm2, %v108_v8 }
  0x1d   :  { %v261_v61 = vunpack.c.l.bf16 %v259_v56  ;;  %356 = vmatpush.bf16.msra.mxu2 %v871_v58 }
  0x1e   :  { %243 = vmatpush.bf16.msra.mxu1 %v862_v18 }
  0x21   :  { %357 = vmatpush.bf16.msra.mxu2 %v870_v63 }
  0x22   :  { %244 = vmatpush.bf16.msra.mxu1 %v861_v21 }
  0x25   :  { %358 = vmatpush.bf16.msra.mxu2 %v869_v2 }
  0x26   :  { %245 = vmatpush.bf16.msra.mxu1 %v860_v25 }
  0x29   :  { %359 = vmatpush.bf16.msra.mxu2 %v868_v6 }
  0x2a   :  { %246 = vmatpush.bf16.msra.mxu1 %v859_v28 }
  0x2d   :  { %360 = vmatpush.bf16.msra.mxu2 %v867_v9 }
  0x2e   :  { %247 = vmatpush.bf16.msra.mxu1 %v858_v31 }
  0x31   :  { %361 = vmatpush.bf16.msra.mxu2 %v866_v12  ;;  %v455_v12 = vld [vmem:[%s1219_s8] sm:$0x1] }
  0x32   :  { %248 = vmatpush.bf16.msra.mxu1 %v857_v34 }
  0x99   :  { %v136_v14 = vpop.f32.mrf.mxu0 }
  0x9a   :  { %v140_v15 = vpack.c.bf16 %v136_v14, %v136_v14 }
  0x9c   :  { %v146_v17 = vunpack.c.l.bf16 %v140_v15  ;;  %v865_v15 = vld [vmem:[%s1216_s5] sm:$0xff] }
  0x9d   :  { %362 = vmatpush.bf16.msra.mxu2 %v865_v15 }
  0x9e   :  { %v148_v19 = vadd.f32 %v147_v16, %v146_v17 }
  0xa0   :  { %v149_v20 = vpack.c.bf16 %v148_v19, %v148_v19 }
  0xa1   :  { %v138_v22 = vpop.f32.mrf.mxu0 }
  0xa2   :  { %v150_v23 = vunpack.c.l.bf16 %v149_v20 }
  0xa4   :  { %v151_v24 = vmul.f32 %v150_v23, %v150_v23 }
  0xa6   :  { %v152_v26 = vpack.c.bf16 %v151_v24, %v151_v24 }
  0xa8   :  { %v153_v27 = vunpack.c.l.bf16 %v152_v26 }
  0xaa   :  { %v154_v29 = vmul.f32 %v153_v27, %v150_v23 }
  0xac   :  { %v155_v30 = vpack.c.bf16 %v154_v29, %v154_v29 }
  0xae   :  { %v156_v32 = vunpack.c.l.bf16 %v155_v30 }
  0xb0   :  { %v157_v33 = vmul.f32 0.044677734, %v156_v32 }
  0xb2   :  { %v158_v35 = vpack.c.bf16 %v157_v33, %v157_v33 }
  0xb4   :  { %v159_v36 = vunpack.c.l.bf16 %v158_v35  ;;  %v369_v35 = vld [vmem:[%s1217_s6] sm:$0x1] }
  0xb6   :  { %v160_v37 = vadd.f32 %v159_v36, %v150_v23  ;;  %v371_v36 = vpack.i.b16 %v369_v35, %v369_v35 }
  0xb8   :  { %v161_v38 = vpack.c.bf16 %v160_v37, %v160_v37  ;;  %v373_v37 = vperm.slane %v371_v36, 0  ;;  %v878_v36 = vld [vmem:[#allocation7 + $0x8] sm:$0xff] }
  0xba   :  { %v162_v39 = vunpack.c.l.bf16 %v161_v38 }
  0xbc   :  { %v163_v40 = vmul.f32 0.796875, %v162_v39 }
  0xbe   :  { %v164_v41 = vpack.c.bf16 %v163_v40, %v163_v40  ;;  %v375_v40 = vunpack.c.l.bf16 %v373_v37 }
  0xc0   :  { %v165_v42 = vunpack.c.l.bf16 %v164_v41  ;;  %v876_v41 = vld [vmem:[%s1218_s7 + $0x18] sm:$0xff] }
  0xc1   :  { %445 = vmatpush.bf16.msra.mxu3 %v876_v41 }
  0xc2   :  { %902 = vtanh.f32 %v165_v42 }
  0xc8   :  { %v903_v43 = vpop.eup %902 }
  0xc9   :  { %v167_v44 = vpack.c.bf16 %v903_v43, %v903_v43  ;;  %v875_v43 = vld [vmem:[%s1218_s7 + $0x10] sm:$0xff] }
  0xca   :  { %446 = vmatpush.bf16.msra.mxu3 %v875_v43 }
  0xcb   :  { %v168_v45 = vunpack.c.l.bf16 %v167_v44 }
  0xcd   :  { %v169_v46 = vadd.f32 1.0, %v168_v45 }
  0xcf   :  { %v170_v47 = vpack.c.bf16 %v169_v46, %v169_v46  ;;  %v874_v46 = vld [vmem:[%s1218_s7 + $0x8] sm:$0xff] }
  0xd0   :  { %447 = vmatpush.bf16.msra.mxu3 %v874_v46 }
  0xd1   :  { %v171_v48 = vunpack.c.l.bf16 %v170_v47 }
  0xd3   :  { %v172_v49 = vmul.f32 0.5, %v171_v48 }
  0xd5   :  { %v173_v50 = vpack.c.bf16 %v172_v49, %v172_v49 }
  0xd7   :  { %v174_v51 = vunpack.c.l.bf16 %v173_v50  ;;  %v873_v50 = vld [vmem:[%s1218_s7] sm:$0xff] }
  0xd8   :  { %448 = vmatpush.bf16.msra.mxu3 %v873_v50 }
  0xd9   :  { %v175_v52 = vmul.f32 %v174_v51, %v150_v23 }
  0xdb   :  { %v176_v53 = vpack.c.bf16 %v175_v52, %v175_v52 }
  0xdd   :  { %249 = vmatmul.bf16.vlgmr.msra.gmra.mxu1 %v176_v53 }
 0x15a   :  { %v250_v59 = vpop.f32.mrf.mxu1 }
 0x15b   :  { %v254_v60 = vpack.c.bf16 %v250_v59, %v250_v59 }
 0x15d   :  { %v260_v62 = vunpack.c.l.bf16 %v254_v60 }
 0x15f   :  { %v262_v0 = vadd.f32 %v261_v61, %v260_v62 }
 0x161   :  { %v263_v1 = vpack.c.bf16 %v262_v0, %v262_v0 }
 0x162   :  { %v252_v3 = vpop.f32.mrf.mxu1 }
 0x163   :  { %v264_v4 = vunpack.c.l.bf16 %v263_v1 }
 0x165   :  { %v265_v5 = vmul.f32 %v264_v4, %v264_v4 }
 0x167   :  { %v266_v7 = vpack.c.bf16 %v265_v5, %v265_v5 }
 0x169   :  { %v267_v8 = vunpack.c.l.bf16 %v266_v7 }
 0x16b   :  { %v268_v10 = vmul.f32 %v267_v8, %v264_v4 }
 0x16d   :  { %v269_v11 = vpack.c.bf16 %v268_v10, %v268_v10 }
 0x16f   :  { %v270_v13 = vunpack.c.l.bf16 %v269_v11 }
 0x171   :  { %v271_v14 = vmul.f32 0.044677734, %v270_v13  ;;  %v457_v13 = vpack.i.b16 %v455_v12, %v455_v12 }
 0x173   :  { %v272_v16 = vpack.c.bf16 %v271_v14, %v271_v14  ;;  %v459_v14 = vperm.slane %v457_v13, 0 }
 0x175   :  { %v273_v17 = vunpack.c.l.bf16 %v272_v16 }
 0x177   :  { %v274_v18 = vadd.f32 %v273_v17, %v264_v4  ;;  %v461_v17 = vunpack.c.l.bf16 %v459_v14  ;;  %v887_v14 = vld [vmem:[#allocation8 + $0x10] sm:$0xff] }
 0x179   :  { %v275_v19 = vpack.c.bf16 %v274_v18, %v274_v18  ;;  %v884_v18 = vld [vmem:[#allocation7 + $0x38] sm:$0xff] }
 0x17a   :  { %555 = vmatpush.bf16.msrb.mxu0 %v884_v18 }
 0x17b   :  { %v276_v20 = vunpack.c.l.bf16 %v275_v19 }
 0x17d   :  { %v277_v21 = vmul.f32 0.796875, %v276_v20  ;;  %v883_v20 = vld [vmem:[#allocation7 + $0x30] sm:$0xff] }
 0x17e   :  { %556 = vmatpush.bf16.msrb.mxu0 %v883_v20  ;;  %v885_v20 = vld [vmem:[#allocation8] sm:$0xff] }
 0x17f   :  { %v278_v22 = vpack.c.bf16 %v277_v21, %v277_v21 }
 0x181   :  { %v279_v23 = vunpack.c.l.bf16 %v278_v22 }
 0x183   :  { %904 = vtanh.f32 %v279_v23  ;;  %v882_v23 = vld [vmem:[#allocation7 + $0x28] sm:$0xff] }
 0x184   :  { %557 = vmatpush.bf16.msrb.mxu0 %v882_v23 }
 0x189   :  { %v905_v24 = vpop.eup %904 }
 0x18a   :  { %v281_v25 = vpack.c.bf16 %v905_v24, %v905_v24 }
 0x18c   :  { %v282_v26 = vunpack.c.l.bf16 %v281_v25 }
 0x18e   :  { %v283_v27 = vadd.f32 1.0, %v282_v26 }
 0x190   :  { %v284_v28 = vpack.c.bf16 %v283_v27, %v283_v27  ;;  %v881_v27 = vld [vmem:[#allocation7 + $0x20] sm:$0xff] }
 0x191   :  { %558 = vmatpush.bf16.msrb.mxu0 %v881_v27 }
 0x192   :  { %v285_v29 = vunpack.c.l.bf16 %v284_v28 }
 0x194   :  { %v286_v30 = vmul.f32 0.5, %v285_v29 }
 0x196   :  { %v287_v31 = vpack.c.bf16 %v286_v30, %v286_v30  ;;  %v880_v30 = vld [vmem:[#allocation7 + $0x18] sm:$0xff] }
 0x197   :  { %559 = vmatpush.bf16.msrb.mxu0 %v880_v30 }
 0x198   :  { %v288_v32 = vunpack.c.l.bf16 %v287_v31 }
 0x19a   :  { %v289_v33 = vmul.f32 %v288_v32, %v264_v4 }
 0x19c   :  { %v290_v34 = vpack.c.bf16 %v289_v33, %v289_v33  ;;  %v879_v33 = vld [vmem:[#allocation7 + $0x10] sm:$0xff] }
 0x19d   :  { %560 = vmatpush.bf16.msrb.mxu0 %v879_v33 }
 0x19e   :  { %363 = vmatmul.bf16.vlgmr.msra.gmra.mxu2 %v290_v34 }
 0x1a1   :  { %561 = vmatpush.bf16.msrb.mxu0 %v878_v36 }
 0x221   :  { %v364_v38 = vpop.f32.mrf.mxu2 }
 0x222   :  { %v368_v39 = vpack.c.bf16 %v364_v38, %v364_v38 }
 0x224   :  { %v374_v42 = vunpack.c.l.bf16 %v368_v39  ;;  %v877_v39 = vld [vmem:[#allocation7] sm:$0xff] }
 0x225   :  { %562 = vmatpush.bf16.msrb.mxu0 %v877_v39 }
 0x226   :  { %v376_v44 = vadd.f32 %v375_v40, %v374_v42 }
 0x228   :  { %v377_v45 = vpack.c.bf16 %v376_v44, %v376_v44 }
 0x229   :  { %v366_v47 = vpop.f32.mrf.mxu2 }
 0x22a   :  { %v378_v48 = vunpack.c.l.bf16 %v377_v45 }
 0x22c   :  { %v379_v49 = vmul.f32 %v378_v48, %v378_v48 }
 0x22e   :  { %v380_v51 = vpack.c.bf16 %v379_v49, %v379_v49 }
 0x230   :  { %v381_v52 = vunpack.c.l.bf16 %v380_v51 }
 0x232   :  { %v382_v53 = vmul.f32 %v381_v52, %v378_v48 }
 0x234   :  { %v383_v54 = vpack.c.bf16 %v382_v53, %v382_v53 }
 0x236   :  { %v384_v55 = vunpack.c.l.bf16 %v383_v54 }
 0x238   :  { %v385_v56 = vmul.f32 0.044677734, %v384_v55 }
 0x23a   :  { %v386_v57 = vpack.c.bf16 %v385_v56, %v385_v56 }
 0x23c   :  { %v387_v58 = vunpack.c.l.bf16 %v386_v57  ;;  %v569_v57 = vld [vmem:[%s1221_s10] sm:$0x1] }
 0x23e   :  { %v388_v59 = vadd.f32 %v387_v58, %v378_v48  ;;  %v571_v58 = vpack.i.b16 %v569_v57, %v569_v57 }
 0x240   :  { %v389_v60 = vpack.c.bf16 %v388_v59, %v388_v59  ;;  %v573_v59 = vperm.slane %v571_v58, 0 }
 0x242   :  { %v390_v61 = vunpack.c.l.bf16 %v389_v60 }
 0x244   :  { %v391_v62 = vmul.f32 0.796875, %v390_v61 }
 0x246   :  { %v392_v63 = vpack.c.bf16 %v391_v62, %v391_v62  ;;  %v575_v62 = vunpack.c.l.bf16 %v573_v59 }
 0x248   :  { %v393_v0 = vunpack.c.l.bf16 %v392_v63  ;;  %v892_v63 = vld [vmem:[#allocation8 + $0x38] sm:$0xff] }
 0x249   :  { %673 = vmatpush.bf16.msrb.mxu3 %v892_v63 }
 0x24a   :  { %906 = vtanh.f32 %v393_v0 }
 0x250   :  { %v907_v1 = vpop.eup %906 }
 0x251   :  { %v395_v2 = vpack.c.bf16 %v907_v1, %v907_v1  ;;  %v891_v1 = vld [vmem:[#allocation8 + $0x30] sm:$0xff] }
 0x252   :  { %674 = vmatpush.bf16.msrb.mxu3 %v891_v1 }
 0x253   :  { %v396_v3 = vunpack.c.l.bf16 %v395_v2 }
 0x255   :  { %v397_v4 = vadd.f32 1.0, %v396_v3 }
 0x257   :  { %v398_v5 = vpack.c.bf16 %v397_v4, %v397_v4  ;;  %v890_v4 = vld [vmem:[#allocation8 + $0x28] sm:$0xff] }
 0x258   :  { %675 = vmatpush.bf16.msrb.mxu3 %v890_v4 }
 0x259   :  { %v399_v6 = vunpack.c.l.bf16 %v398_v5 }
 0x25b   :  { %v400_v7 = vmul.f32 0.5, %v399_v6 }
 0x25d   :  { %v401_v8 = vpack.c.bf16 %v400_v7, %v400_v7 }
 0x25f   :  { %v402_v9 = vunpack.c.l.bf16 %v401_v8  ;;  %v889_v8 = vld [vmem:[#allocation8 + $0x20] sm:$0xff] }
 0x260   :  { %676 = vmatpush.bf16.msrb.mxu3 %v889_v8 }
 0x261   :  { %v403_v10 = vmul.f32 %v402_v9, %v378_v48 }
 0x263   :  { %v404_v11 = vpack.c.bf16 %v403_v10, %v403_v10 }
 0x265   :  { %791 = vmatmul.msk.bf16.vlgmr.msra.gmra.mxu3 %vm437_vm3, %v404_v11  ;;  %v888_v11 = vld [vmem:[#allocation8 + $0x18] sm:$0xff] }
 0x266   :  { %677 = vmatpush.bf16.msrb.mxu3 %v888_v11 }
 0x26a   :  { %678 = vmatpush.bf16.msrb.mxu3 %v887_v14 }
 0x2e8   :  { %v450_v15 = vpop.f32.mrf.mxu3 }
 0x2e9   :  { %v454_v16 = vpack.c.bf16 %v450_v15, %v450_v15 }
 0x2eb   :  { %v460_v19 = vunpack.c.l.bf16 %v454_v16 }
 0x2ed   :  { %v462_v21 = vadd.f32 %v461_v17, %v460_v19  ;;  %v886_v17 = vld [vmem:[#allocation8 + $0x8] sm:$0xff] }
 0x2ee   :  { %679 = vmatpush.bf16.msrb.mxu3 %v886_v17 }
 0x2ef   :  { %v463_v22 = vpack.c.bf16 %v462_v21, %v462_v21 }
 0x2f0   :  { %v452_v24 = vpop.f32.mrf.mxu3 }
 0x2f1   :  { %v464_v25 = vunpack.c.l.bf16 %v463_v22 }
 0x2f2   :  { %680 = vmatpush.bf16.msrb.mxu3 %v885_v20 }
 0x2f3   :  { %v465_v26 = vmul.f32 %v464_v25, %v464_v25 }
 0x2f5   :  { %v466_v28 = vpack.c.bf16 %v465_v26, %v465_v26 }
 0x2f7   :  { %v467_v29 = vunpack.c.l.bf16 %v466_v28 }
 0x2f9   :  { %v468_v31 = vmul.f32 %v467_v29, %v464_v25 }
 0x2fb   :  { %v469_v32 = vpack.c.bf16 %v468_v31, %v468_v31 }
 0x2fd   :  { %v470_v34 = vunpack.c.l.bf16 %v469_v32 }
 0x2ff   :  { %v471_v35 = vmul.f32 0.044677734, %v470_v34 }
 0x301   :  { %v472_v37 = vpack.c.bf16 %v471_v35, %v471_v35 }
 0x303   :  { %v473_v38 = vunpack.c.l.bf16 %v472_v37 }
 0x305   :  { %v474_v40 = vadd.f32 %v473_v38, %v464_v25  ;;  %v901_v38 = vld [vmem:[%s1223_s12] ss:$0 sm:$0xff] }
 0x307   :  { %v475_v41 = vpack.c.bf16 %v474_v40, %v474_v40 }
 0x309   :  { %v476_v42 = vunpack.c.l.bf16 %v475_v41 }
 0x30b   :  { %v477_v43 = vmul.f32 0.796875, %v476_v42 }
 0x30d   :  { %v478_v44 = vpack.c.bf16 %v477_v43, %v477_v43 }
 0x30f   :  { %v479_v45 = vunpack.c.l.bf16 %v478_v44 }
 0x311   :  { %908 = vtanh.f32 %v479_v45 }
 0x317   :  { %v909_v46 = vpop.eup %908 }
 0x318   :  { %v481_v47 = vpack.c.bf16 %v909_v46, %v909_v46 }
 0x31a   :  { %v482_v48 = vunpack.c.l.bf16 %v481_v47 }
 0x31c   :  { %v483_v49 = vadd.f32 1.0, %v482_v48 }
 0x31e   :  { %v484_v50 = vpack.c.bf16 %v483_v49, %v483_v49 }
 0x320   :  { %v485_v51 = vunpack.c.l.bf16 %v484_v50 }
 0x322   :  { %v486_v52 = vmul.f32 0.5, %v485_v51 }
 0x324   :  { %v487_v53 = vpack.c.bf16 %v486_v52, %v486_v52 }
 0x326   :  { %v488_v54 = vunpack.c.l.bf16 %v487_v53 }
 0x328   :  { %v489_v55 = vmul.f32 %v488_v54, %v464_v25 }
 0x32a   :  { %v490_v56 = vpack.c.bf16 %v489_v55, %v489_v55 }
 0x32c   :  { %563 = vmatmul.bf16.vlgmr.msrb.gmra.mxu0 %v490_v56 }
 0x3a9   :  { %v564_v60 = vpop.f32.mrf.mxu0 }
 0x3aa   :  { %v568_v61 = vpack.c.bf16 %v564_v60, %v564_v60 }
 0x3ac   :  { %v574_v0 = vunpack.c.l.bf16 %v568_v61 }
 0x3ae   :  { %v576_v2 = vadd.f32 %v575_v62, %v574_v0 }
 0x3b0   :  { %v577_v3 = vpack.c.bf16 %v576_v2, %v576_v2 }
 0x3b1   :  { %v566_v5 = vpop.f32.mrf.mxu0 }
 0x3b2   :  { %v578_v6 = vunpack.c.l.bf16 %v577_v3 }
 0x3b4   :  { %v579_v7 = vmul.f32 %v578_v6, %v578_v6 }
 0x3b6   :  { %v580_v9 = vpack.c.bf16 %v579_v7, %v579_v7 }
 0x3b8   :  { %v581_v10 = vunpack.c.l.bf16 %v580_v9 }
 0x3ba   :  { %v582_v12 = vmul.f32 %v581_v10, %v578_v6 }
 0x3bc   :  { %v583_v13 = vpack.c.bf16 %v582_v12, %v582_v12 }
 0x3be   :  { %v584_v15 = vunpack.c.l.bf16 %v583_v13 }
 0x3c0   :  { %v585_v16 = vmul.f32 0.044677734, %v584_v15 }
 0x3c2   :  { %v586_v18 = vpack.c.bf16 %v585_v16, %v585_v16 }
 0x3c4   :  { %v587_v19 = vunpack.c.l.bf16 %v586_v18 }
 0x3c6   :  { %v588_v21 = vadd.f32 %v587_v19, %v578_v6 }
 0x3c8   :  { %v589_v22 = vpack.c.bf16 %v588_v21, %v588_v21 }
 0x3ca   :  { %v590_v23 = vunpack.c.l.bf16 %v589_v22 }
 0x3cc   :  { %v591_v24 = vmul.f32 0.796875, %v590_v23 }
 0x3ce   :  { %v592_v25 = vpack.c.bf16 %v591_v24, %v591_v24 }
 0x3d0   :  { %v593_v26 = vunpack.c.l.bf16 %v592_v25 }
 0x3d2   :  { %910 = vtanh.f32 %v593_v26 }
 0x3d8   :  { %v911_v27 = vpop.eup %910 }
 0x3d9   :  { %v595_v28 = vpack.c.bf16 %v911_v27, %v911_v27 }
 0x3db   :  { %v596_v29 = vunpack.c.l.bf16 %v595_v28 }
 0x3dd   :  { %v597_v30 = vadd.f32 1.0, %v596_v29 }
 0x3df   :  { %v598_v31 = vpack.c.bf16 %v597_v30, %v597_v30 }
 0x3e1   :  { %v599_v32 = vunpack.c.l.bf16 %v598_v31 }
 0x3e3   :  { %v600_v33 = vmul.f32 0.5, %v599_v32 }
 0x3e5   :  { %v601_v34 = vpack.c.bf16 %v600_v33, %v600_v33 }
 0x3e7   :  { %v602_v35 = vunpack.c.l.bf16 %v601_v34 }
 0x3e9   :  { %v603_v36 = vmul.f32 %v602_v35, %v578_v6 }
 0x3eb   :  { %v604_v37 = vpack.c.bf16 %v603_v36, %v603_v36 }
 0x3ed   :  { %681 = vmatmul.bf16.vlgmr.msrb.gmra.mxu3 %v604_v37 }
 0x470   :  { %v682_v39 = vpop.f32.mrf.mxu3 }
 0x471   :  { %v683_v40 = vadd.f32 %v901_v38, %v682_v39 }
 0x473   :  { %686 = vst [vmem:[#allocation10] sm:$0xff] %v683_v40 }
 0x474   :  { %697 = dma.vmem_to_hbm [thread:$0]  %s693_s11, 128, %s695_s29, [#allocation4]  }
 0x478   :  { %v684_v41 = vpop.f32.mrf.mxu3 }
 0x479   :  { %1038 = dma.done.wait [#allocation4], 128  }
 0x47a   :  { %1039 = vsyncadd [#allocation4], 4294967168 }
 0x47b   :  { %702 = vsyncpa [#allocation3], 1 }
 0x47c   :  { %703 = vsyncpa [#allocation6], 1 }
 0x47d   :  { %704 = vsyncpa [#allocation9], 1 }
 0x47e   :  { %705 = vsyncpa [#allocation4], 1 }

</bundles_post_ra>
